<compile_context>
chip_gen: v5e
topology: v5e:2x2
jax: 0.10.0
libtpu: 0.0.40
codegen_flags: <defaults>
</compile_context>

<pallas_src>
import jax
import jax.numpy as jnp
from jax.experimental import pallas as pl
from jax.experimental.pallas import tpu as pltpu


def _upsample_conv_kernel(xa_ref, xh0_ref, xh1_ref, w_ref, b_ref, o_ref):
    # xa_ref : (1, TH, W+2, Cin)   main rows of the zero-padded input tile
    # xh0_ref: (1, 1,  W+2, Cin)   halo row  TH   (relative to tile start)
    # xh1_ref: (1, 1,  W+2, Cin)   halo row  TH+1
    # w_ref  : (9*Cin, 4*Cout)     phase-folded conv weights
    # b_ref  : (1, 4*Cout)         phase-replicated bias
    # o_ref  : (1, TH*W, 4*Cout)
    th = xa_ref.shape[1]
    wp = xa_ref.shape[2]          # W + 2
    cin = xa_ref.shape[3]
    w = wp - 2

    # Padded input window for this row tile: rows [0, TH+2).
    xwin = jnp.concatenate([xa_ref[0], xh0_ref[0], xh1_ref[0]], axis=0)

    # Build the im2col tile once: (TH*W, 9*Cin), tap order (jy, jx) row-major,
    # channel minor -- matches the row layout of w_ref.
    cols = []
    for jy in range(3):
        for jx in range(3):
            patch = xwin[jy:jy + th, jx:jx + w, :]        # (TH, W, Cin)
            cols.append(patch.reshape(th * w, cin))
    x9 = jnp.concatenate(cols, axis=-1)                   # (TH*W, 9*Cin)

    # Single MXU matmul producing all 4 output phases at once.
    acc = jnp.dot(x9, w_ref[...], preferred_element_type=jnp.float32)
    acc = acc + b_ref[...]                                # (1, 4*Cout) broadcast
    o_ref[0] = acc.astype(o_ref.dtype)


def _auto_tile_h(h, w, cin, cout, budget_bytes=8 * 1024 * 1024):
    """Largest row tile (divisor of H) whose per-step working set fits the budget."""
    for th in range(h, 0, -1):
        if h % th:
            continue
        approx = 4 * (9 * th * w * cin                     # im2col temporary
                      + 4 * (th + 2) * (w + 2) * cin       # ~double-buffered input
                      + 2 * th * w * 4 * cout)             # double-buffered output
        if approx <= budget_bytes:
            return th
    return 1


def upsample_layer_forward(x_nchw, weight_oihw, bias, tile_h=None):
    """Forward pass of Upsample_Layer (nearest x2 upsample + 3x3 conv, pad 1).

    x_nchw:      (N, Cin, H, W)    float32
    weight_oihw: (Cout, Cin, 3, 3) float32  (PyTorch Conv2d layout)
    bias:        (Cout,)           float32
    returns:     (N, Cout, 2H, 2W) float32
    """
    n, cin, h, w = x_nchw.shape
    cout = weight_oihw.shape[0]

    # --- layout + zero pad on the ORIGINAL-resolution image (fused by XLA) ---
    x = jnp.transpose(x_nchw, (0, 2, 3, 1))                       # NHWC
    xp = jnp.pad(x, ((0, 0), (1, 1), (1, 1), (0, 0)))             # (N, H+2, W+2, Cin)

    # --- fold nearest-x2 upsample into 4 phase weights (subpixel decomposition)
    # For output parity py: original tap ky maps to input offset dy:
    #   py=0: ky=0 -> -1, ky=1 -> 0, ky=2 -> 0
    #   py=1: ky=0 ->  0, ky=1 -> 0, ky=2 -> +1
    # A[p, j, k] = 1 iff tap k maps to offset index j (= dy+1) for parity p.
    w_hwio = jnp.transpose(weight_oihw, (2, 3, 1, 0)).astype(jnp.float32)  # (3,3,Cin,Cout)
    A = jnp.array([[[1., 0., 0.], [0., 1., 1.], [0., 0., 0.]],
                   [[0., 0., 0.], [1., 1., 0.], [0., 0., 1.]]], dtype=jnp.float32)
    # weff[py, px, jy, jx, ci, co]
    weff = jnp.einsum('pjk,qlm,kmio->pqjlio', A, A, w_hwio)
    wc = jnp.transpose(weff, (2, 3, 4, 0, 1, 5)).reshape(9 * cin, 4 * cout)
    bc = jnp.tile(bias.astype(jnp.float32), 4).reshape(1, 4 * cout)

    if tile_h is None:
        tile_h = _auto_tile_h(h, w, cin, cout)
    assert h % tile_h == 0, "tile_h must divide H"
    n_tiles = h // tile_h

    kernel_out = pl.pallas_call(
        _upsample_conv_kernel,
        out_shape=jax.ShapeDtypeStruct((n, h * w, 4 * cout), x_nchw.dtype),
        grid_spec=pltpu.PrefetchScalarGridSpec(
            num_scalar_prefetch=0,
            grid=(n, n_tiles),
            in_specs=[
                # main TH rows of the padded image for this tile
                pl.BlockSpec((1, tile_h, w + 2, cin),
                             lambda b, r: (b, r, 0, 0)),
                # two single-row halo blocks below the tile (same array)
                pl.BlockSpec((1, 1, w + 2, cin),
                             lambda b, r: (b, (r + 1) * tile_h, 0, 0)),
                pl.BlockSpec((1, 1, w + 2, cin),
                             lambda b, r: (b, (r + 1) * tile_h + 1, 0, 0)),
                # folded weights + bias (resident, fetched once)
                pl.BlockSpec((9 * cin, 4 * cout), lambda b, r: (0, 0)),
                pl.BlockSpec((1, 4 * cout), lambda b, r: (0, 0)),
            ],
            out_specs=pl.BlockSpec((1, tile_h * w, 4 * cout),
                                   lambda b, r: (b, r, 0)),
        ),
        compiler_params=pltpu.CompilerParams(
            dimension_semantics=("parallel", "parallel"),
            vmem_limit_bytes=32 * 1024 * 1024),
    )(xp, xp, xp, wc, bc)

    # --- depth-to-space + NCHW: (N, H*W, 2*2*Cout) -> (N, Cout, 2H, 2W) -------
    y = kernel_out.reshape(n, h, w, 2, 2, cout)          # (n, iy, ix, py, px, co)
    y = jnp.transpose(y, (0, 5, 1, 3, 2, 4))             # (n, co, iy, py, ix, px)
    return y.reshape(n, cout, 2 * h, 2 * w)


def _reference_forward(x_nchw, weight_oihw, bias):
    # Pure-JAX reference (nearest upsample x2 + conv2d same padding).
    x = jnp.repeat(jnp.repeat(x_nchw, 2, axis=2), 2, axis=3)
    y = jax.lax.conv_general_dilated(
        x, weight_oihw, window_strides=(1, 1), padding=((1, 1), (1, 1)),
        dimension_numbers=("NCHW", "OIHW", "NCHW"))
    return y + bias.reshape(1, -1, 1, 1)


if __name__ == "__main__":
    key = jax.random.PRNGKey(0)
    k_x, k_w, k_b = jax.random.split(key, 3)

    N, CIN, COUT, H, W = 2, 4, 8, 16, 16

    x = jax.random.normal(k_x, (N, CIN, H, W), dtype=jnp.float32)
    weight = jax.random.normal(k_w, (COUT, CIN, 3, 3), dtype=jnp.float32) * 0.1
    bias = jax.random.normal(k_b, (COUT,), dtype=jnp.float32) * 0.1

    fwd = jax.jit(upsample_layer_forward, static_argnames="tile_h")
    y = fwd(x, weight, bias, tile_h=8)        # 2 row tiles per image -> 4 grid steps
    y = jax.block_until_ready(y)

    y_ref = _reference_forward(x, weight, bias)
    assert y.shape == (N, COUT, 2 * H, 2 * W)
    assert jnp.allclose(y, y_ref, atol=1e-4, rtol=1e-4)

    print("KERNEL_OK")
</pallas_src>

<mosaic_0001>
module attributes {stable_mosaic.version = 11 : i64} {
  func.func @_upsample_conv_kernel(%arg0: i32, %arg1: i32, %arg2: memref<1x8x18x4xf32, #tpu.memory_space<vmem>>, %arg3: memref<1x1x18x4xf32, #tpu.memory_space<vmem>>, %arg4: memref<1x1x18x4xf32, #tpu.memory_space<vmem>>, %arg5: memref<36x32xf32, #tpu.memory_space<vmem>>, %arg6: memref<1x32xf32, #tpu.memory_space<vmem>>, %arg7: memref<1x128x32xf32, #tpu.memory_space<vmem>>) attributes {dimension_semantics = [#tpu.dimension_semantics<parallel>, #tpu.dimension_semantics<parallel>], iteration_bounds = array<i64: 2, 2>, scalar_prefetch = 0 : i64, scratch_operands = 0 : i64, tpu.core_type = #tpu.core_type<tc>, window_params = [{transform_indices = @transform_0, window_bounds = array<i64: 1, 8, 18, 4>}, {transform_indices = @transform_1, window_bounds = array<i64: 1, 1, 18, 4>}, {transform_indices = @transform_2, window_bounds = array<i64: 1, 1, 18, 4>}, {pipeline_mode = #tpu.pipeline_mode<synchronous>, transform_indices = @transform_3, window_bounds = array<i64: 36, 32>}, {pipeline_mode = #tpu.pipeline_mode<synchronous>, transform_indices = @transform_4, window_bounds = array<i64: 1, 32>}, {transform_indices = @transform_5, window_bounds = array<i64: 1, 128, 32>}]} {
    %c0 = arith.constant 0 : index
    %c0_0 = arith.constant 0 : index
    %c0_1 = arith.constant 0 : index
    %c0_2 = arith.constant 0 : index
    %0 = vector.load %arg2[%c0, %c0_0, %c0_1, %c0_2] : memref<1x8x18x4xf32, #tpu.memory_space<vmem>>, vector<1x8x18x4xf32>
    %1 = vector.shape_cast %0 : vector<1x8x18x4xf32> to vector<8x18x4xf32>
    %c0_3 = arith.constant 0 : index
    %c0_4 = arith.constant 0 : index
    %c0_5 = arith.constant 0 : index
    %c0_6 = arith.constant 0 : index
    %2 = vector.load %arg3[%c0_3, %c0_4, %c0_5, %c0_6] : memref<1x1x18x4xf32, #tpu.memory_space<vmem>>, vector<1x1x18x4xf32>
    %3 = vector.shape_cast %2 : vector<1x1x18x4xf32> to vector<1x18x4xf32>
    %c0_7 = arith.constant 0 : index
    %c0_8 = arith.constant 0 : index
    %c0_9 = arith.constant 0 : index
    %c0_10 = arith.constant 0 : index
    %4 = vector.load %arg4[%c0_7, %c0_8, %c0_9, %c0_10] : memref<1x1x18x4xf32, #tpu.memory_space<vmem>>, vector<1x1x18x4xf32>
    %5 = vector.shape_cast %4 : vector<1x1x18x4xf32> to vector<1x18x4xf32>
    %6 = tpu.concatenate %1, %3, %5 in 0 : vector<8x18x4xf32>, vector<1x18x4xf32>, vector<1x18x4xf32> -> vector<10x18x4xf32>
    %7 = vector.extract_strided_slice %6 {offsets = [0, 0, 0], sizes = [8, 16, 4], strides = [1, 1, 1]} : vector<10x18x4xf32> to vector<8x16x4xf32>
    %8 = vector.shape_cast %7 : vector<8x16x4xf32> to vector<128x4xf32>
    %9 = vector.extract_strided_slice %6 {offsets = [0, 1, 0], sizes = [8, 16, 4], strides = [1, 1, 1]} : vector<10x18x4xf32> to vector<8x16x4xf32>
    %10 = vector.shape_cast %9 : vector<8x16x4xf32> to vector<128x4xf32>
    %11 = vector.extract_strided_slice %6 {offsets = [0, 2, 0], sizes = [8, 16, 4], strides = [1, 1, 1]} : vector<10x18x4xf32> to vector<8x16x4xf32>
    %12 = vector.shape_cast %11 : vector<8x16x4xf32> to vector<128x4xf32>
    %13 = vector.extract_strided_slice %6 {offsets = [1, 0, 0], sizes = [8, 16, 4], strides = [1, 1, 1]} : vector<10x18x4xf32> to vector<8x16x4xf32>
    %14 = vector.shape_cast %13 : vector<8x16x4xf32> to vector<128x4xf32>
    %15 = vector.extract_strided_slice %6 {offsets = [1, 1, 0], sizes = [8, 16, 4], strides = [1, 1, 1]} : vector<10x18x4xf32> to vector<8x16x4xf32>
    %16 = vector.shape_cast %15 : vector<8x16x4xf32> to vector<128x4xf32>
    %17 = vector.extract_strided_slice %6 {offsets = [1, 2, 0], sizes = [8, 16, 4], strides = [1, 1, 1]} : vector<10x18x4xf32> to vector<8x16x4xf32>
    %18 = vector.shape_cast %17 : vector<8x16x4xf32> to vector<128x4xf32>
    %19 = vector.extract_strided_slice %6 {offsets = [2, 0, 0], sizes = [8, 16, 4], strides = [1, 1, 1]} : vector<10x18x4xf32> to vector<8x16x4xf32>
    %20 = vector.shape_cast %19 : vector<8x16x4xf32> to vector<128x4xf32>
    %21 = vector.extract_strided_slice %6 {offsets = [2, 1, 0], sizes = [8, 16, 4], strides = [1, 1, 1]} : vector<10x18x4xf32> to vector<8x16x4xf32>
    %22 = vector.shape_cast %21 : vector<8x16x4xf32> to vector<128x4xf32>
    %23 = vector.extract_strided_slice %6 {offsets = [2, 2, 0], sizes = [8, 16, 4], strides = [1, 1, 1]} : vector<10x18x4xf32> to vector<8x16x4xf32>
    %24 = vector.shape_cast %23 : vector<8x16x4xf32> to vector<128x4xf32>
    %25 = tpu.concatenate %8, %10, %12, %14, %16, %18, %20, %22, %24 in 1 : vector<128x4xf32>, vector<128x4xf32>, vector<128x4xf32>, vector<128x4xf32>, vector<128x4xf32>, vector<128x4xf32>, vector<128x4xf32>, vector<128x4xf32>, vector<128x4xf32> -> vector<128x36xf32>
    %c0_11 = arith.constant 0 : index
    %c0_12 = arith.constant 0 : index
    %26 = vector.load %arg5[%c0_11, %c0_12] : memref<36x32xf32, #tpu.memory_space<vmem>>, vector<36x32xf32>
    %cst = arith.constant dense<0.000000e+00> : vector<128x32xf32>
    %27 = tpu.matmul %25, %26, %cst {dimension_numbers = #tpu.dot_dimension_numbers<[1], [0], [0], [1], [0, 0, 1, 1], [], []>} : vector<128x36xf32>, vector<36x32xf32>, vector<128x32xf32> -> vector<128x32xf32>
    %c0_13 = arith.constant 0 : index
    %c0_14 = arith.constant 0 : index
    %28 = vector.load %arg6[%c0_13, %c0_14] : memref<1x32xf32, #tpu.memory_space<vmem>>, vector<1x32xf32>
    %29 = vector.broadcast %28 : vector<1x32xf32> to vector<128x32xf32>
    %30 = arith.addf %27, %29 : vector<128x32xf32>
    %c0_15 = arith.constant 0 : index
    %c0_16 = arith.constant 0 : index
    %c0_17 = arith.constant 0 : index
    %31 = vector.load %arg7[%c0_15, %c0_16, %c0_17] : memref<1x128x32xf32, #tpu.memory_space<vmem>>, vector<1x128x32xf32>
    %32 = vector.shape_cast %31 : vector<1x128x32xf32> to vector<128x32xf32>
    %33 = vector.shape_cast %30 : vector<128x32xf32> to vector<1x128x32xf32>
    tpu.vector_store %arg7[%c0_15, %c0_16, %c0_17], %33 {strides = array<i32>} : memref<1x128x32xf32, #tpu.memory_space<vmem>>, vector<1x128x32xf32>,
    return
  }
  func.func @transform_0(%arg0: i32, %arg1: i32) -> (i32, i32, i32, i32) {
    %c0_i32 = arith.constant 0 : i32
    %c0_i32_0 = arith.constant 0 : i32
    %c0_i32_1 = arith.constant 0 : i32
    return %arg0, %arg1, %c0_i32, %c0_i32_0 : i32, i32, i32, i32
  }
  func.func @transform_1(%arg0: i32, %arg1: i32) -> (i32, i32, i32, i32) {
    %c1_i32 = arith.constant 1 : i32
    %0 = arith.addi %arg1, %c1_i32 : i32
    %c8_i32 = arith.constant 8 : i32
    %1 = arith.muli %0, %c8_i32 : i32
    %c0_i32 = arith.constant 0 : i32
    %c0_i32_0 = arith.constant 0 : i32
    %c0_i32_1 = arith.constant 0 : i32
    return %arg0, %1, %c0_i32, %c0_i32_0 : i32, i32, i32, i32
  }
  func.func @transform_2(%arg0: i32, %arg1: i32) -> (i32, i32, i32, i32) {
    %c1_i32 = arith.constant 1 : i32
    %0 = arith.addi %arg1, %c1_i32 : i32
    %c8_i32 = arith.constant 8 : i32
    %1 = arith.muli %0, %c8_i32 : i32
    %c1_i32_0 = arith.constant 1 : i32
    %2 = arith.addi %1, %c1_i32_0 : i32
    %c0_i32 = arith.constant 0 : i32
    %c0_i32_1 = arith.constant 0 : i32
    %c0_i32_2 = arith.constant 0 : i32
    return %arg0, %2, %c0_i32, %c0_i32_1 : i32, i32, i32, i32
  }
  func.func @transform_3(%arg0: i32, %arg1: i32) -> (i32, i32) {
    %c0_i32 = arith.constant 0 : i32
    %c0_i32_0 = arith.constant 0 : i32
    %c0_i32_1 = arith.constant 0 : i32
    return %c0_i32, %c0_i32_0 : i32, i32
  }
  func.func @transform_4(%arg0: i32, %arg1: i32) -> (i32, i32) {
    %c0_i32 = arith.constant 0 : i32
    %c0_i32_0 = arith.constant 0 : i32
    %c0_i32_1 = arith.constant 0 : i32
    return %c0_i32, %c0_i32_0 : i32, i32
  }
  func.func @transform_5(%arg0: i32, %arg1: i32) -> (i32, i32, i32) {
    %c0_i32 = arith.constant 0 : i32
    %c0_i32_0 = arith.constant 0 : i32
    return %arg0, %arg1, %c0_i32 : i32, i32, i32
  }
}

</mosaic_0001>

<bundles_post_ra>
// kernel: tile.9
= control target key start
LH: loop header
LB: loop body
LE: loop exit
PB: predicated region body
PF: predicated region fallthrough
CT: control target
= control target key end

     0   :  { %s37_s8 = smov 8   ;;  %s38_s9 = smov 16   ;;  %vm7_vm0 = vcmask 64512   ;;  %vm13_vm1 = vcmask 261312   ;;  %vm19_vm2 = vcmask 195712   ;;  %vm25_vm3 = vcmask 130112   ;;  %s55_s0 = inlined_call_operand.vmem [shape: f32[4,8], index: 0, kind: input, shape index: {}]   ;;  %s56_s1 = inlined_call_operand.vmem [shape: f32[1,32], index: 1, kind: output, shape index: {}]  }
   0x1   :  { %v4_v0 = vld [vmem:[%s55_s0] sm:$0xf]  ;;  %s36_s0 = smov 24  }
   0x2   :  { %5 = vst [vmem:[#allocation1] sm:$0xf] %v4_v0 }
   0x9   :  { %v10_v1 = vld [vmem:[#allocation1 + $0x3] sm:$0x1]   ;;  %v22_v2 = vld [vmem:[#allocation1 + $0x1] sm:$0x1]   ;;  %v16_v3 = vld [vmem:[#allocation1 + $0x2] sm:$0x1]  }
   0xa   :  { %11 = vrot.lane.b32.xlu0 %v10_v1, %s36_s0  ;;  %23 = vrot.lane.b32.xlu1 %v22_v2, %s37_s8  ;;  %v6_v4 = vld [vmem:[#allocation1] sm:$0x1]  }
   0xb   :  { %8 = vst.msk [vmem:[#allocation0] sm:$0x1] %vm7_vm0, %v6_v4  }
  0x12   :  { %17 = vrot.lane.b32.xlu0 %v16_v3, %s38_s9 }
  0x7c   :  { %v12_v5 = vpop.permute.xlu0 %11   ;;  %v24_v6 = vpop.permute.xlu1 %23  }
  0x7d   :  { %14 = vst.msk [vmem:[#allocation0] sm:$0x1] %vm13_vm1, %v12_v5  }
  0x84   :  { %v18_v7 = vpop.permute.xlu0 %17  }
  0x85   :  { %20 = vst.msk [vmem:[#allocation0] sm:$0x1] %vm19_vm2, %v18_v7  }
  0x86   :  { %26 = vst.msk [vmem:[#allocation0] sm:$0x1] %vm25_vm3, %v24_v6  }
  0x8d   :  { %v29_v8 = vld [vmem:[#allocation0] sm:$0x1] }
  0x8e   :  { %32 = vst [vmem:[%s56_s1] sm:$0x1] %v29_v8 }

// kernel: tile.8
= control target key start
LH: loop header
LB: loop body
LE: loop exit
PB: predicated region body
PF: predicated region fallthrough
CT: control target
= control target key end

     0   :  { %s22_s0 = inlined_call_operand.vmem [shape: f32[8], index: 0, kind: input, shape index: {}]   ;;  %s23_s1 = inlined_call_operand.vmem [shape: f32[4,8], index: 1, kind: output, shape index: {}]  }
   0x1   :  { %v4_v0 = vld [vmem:[%s22_s0] ss:$0 sm:$0xff] }
   0x2   :  { %5 = vst [vmem:[%s23_s1] sm:$0xf] %v4_v0 }

// kernel: upsample_layer_forward.1
= control target key start
LH: loop header
LB: loop body
LE: loop exit
PB: predicated region body
PF: predicated region fallthrough
CT: control target
= control target key end

     0   :  { %s1550_s18 = smov 0   ;;  %s1552_s19 = smov 0   ;;  %s2478_s0 = inlined_call_operand.vmem [shape: f32[2,18,18,4], index: 0, kind: input, shape index: {}, may-alias: {0,1,2}]   ;;  %s2479_s1 = inlined_call_operand.vmem [shape: f32[2,18,18,4], index: 1, kind: input, shape index: {}, may-alias: {0,1,2}]   ;;  %s2480_s2 = inlined_call_operand.vmem [shape: f32[2,18,18,4], index: 2, kind: input, shape index: {}, may-alias: {0,1,2}]   ;;  %s2481_s3 = inlined_call_operand.vmem [shape: f32[36,32], index: 3, kind: input, shape index: {}]   ;;  %s2482_s4 = inlined_call_operand.vmem [shape: f32[1,32], index: 4, kind: input, shape index: {}]   ;;  %s2483_s5 = inlined_call_operand.vmem [shape: f32[2,256,32], index: 5, kind: output, shape index: {}]  }
   0x1   :  { %s1554_s20 = smov 0   ;;  %s1556_s21 = smov 0  }
   0x2   :  { %s1558_s22 = smov 0  }
   0x3 LB: > { %s24_s23 = sadd.s32 1, %s1502_s20  ;;  %s27_s24 = sadd.s32 1, %s1506_s21  ;;  %s1510_s22 = sphi %s1558_s22, %s15_s22   ;;  %s1506_s21 = sphi %s1556_s21, %s2496_s21   ;;  %s1502_s20 = sphi %s1554_s20, %s2495_s20   ;;  %s1498_s19 = sphi %s1552_s19, %s2494_s19   ;;  %s1494_s18 = sphi %s1550_s18, %s2493_s18  }
   0x4   : > { %p25_p0 = scmp.ge.s32.totalorder %s24_s23, 2  ;;  %p1363_p1 = scmp.ge.s32.totalorder %s1510_s22, 1 }
   0x5   : > { %p271_p2 = scmp.lt.s32.totalorder %s1510_s22, 5 }
   0x6   : > { %s2498_s23 = smov (%p25_p0, %s24_s23), 0  ;;  %s2500_s24 = smov (!%p25_p0, %s27_s24), %s1506_s21 }
   0x7   : > { %p272_p3 = pnand %p1363_p1, %p271_p2  ;;  %p29_p4 = scmp.ge.s32.totalorder %s2500_s24, 2 }
   0x9   : > { %s2502_s24 = smov (%p29_p4, %s2500_s24), 0  ;;  %275 = sbr.rel (%p272_p3) target bundleno = 611 (0x263), region = 40 }
   0xe   : > { %s1583_s25 = sshll.u32 %s1494_s18, 3  ;;  %p342_p5 = scmp.lt.s32.totalorder %s1498_s19, 1  ;;  %vm449_vm0 = vcmask 1046528   ;;  %vm490_vm1 = vcmask 1045504   ;;  %vm958_vm2 = vcmask 64512   ;;  %vm941_vm3 = vcmask 31744  }
   0xf   : > { %p344_p6 = scmp.lt.s32.totalorder %s1583_s25, 17  ;;  %s1512_s9 = smov 4   ;;  %vm975_vm4 = vcmask 97280   ;;  %vm992_vm5 = vcmask 130048   ;;  %vm1135_vm6 = vcmask 1043456   ;;  %vm1009_vm7 = vcmask 162816  }
  0x10   : > { %s2504_s19 = smov (!%p342_p5, %s1498_s19), 1  ;;  %s1513_s10 = smov 8   ;;  %vm1026_vm8 = vcmask 195584   ;;  %vm1043_vm9 = vcmask 228352   ;;  %vm1060_vm10 = vcmask 261120   ;;  %vm1086_vm11 = vcmask 293888  }
  0x11   : > { %s345_s26 = scalar_select %p344_p6, %s1583_s25, 17 }
  0x12   : > { %s1590_s27 = smul.u32 54, %s2504_s19  ;;  %s1514_s11 = smov 12  }
  0x13   : > { %s1419_s28 = smul.u32 3, %s345_s26  ;;  %s1875_s12 = sadd.s32 8, %s1583_s25 }
  0x14   : > { %p361_p7 = scmp.lt.s32.totalorder %s1875_s12, 17  ;;  %s1518_s6 = smov 24  }
  0x15   : > { %s348_s29 = sadd.s32 %s1590_s27, %s1419_s28  ;;  %s1515_s28 = smov 16  }
  0x16   : > { %s1365_s30 = sshll.u32 %s348_s29, 3  ;;  %s1516_s29 = smov 20  }
  0x17   : > { %s1596_s8 = scalar_lea.vmem %s2478_s0, %s1365_s30  ;;  %s1517_s30 = smov 28  }
  0x18   : > { %v1599_v0 = vld [vmem:[%s1596_s8 + $0x30] sm:$0xff]  ;;  %v1602_v1 = vld [vmem:[%s1596_s8 + $0x38] sm:$0xff]  ;;  %v1610_v5 = vld [vmem:[%s1596_s8 + $0x20] sm:$0xff]  ;;  %s362_s13 = scalar_select %p361_p7, %s1875_s12, 17 }
  0x19   : > { %v1605_v2 = vld [vmem:[%s1596_s8 + $0x18] sm:$0xff]  ;;  %v460_v3 = vrot.slane %v1599_v0, 1  ;;  %v461_v4 = vrot.slane %v1602_v1, 1  ;;  %v1614_v7 = vld [vmem:[%s1596_s8] sm:$0xff]  ;;  %v1617_v8 = vld [vmem:[%s1596_s8 + $0x8] sm:$0xff]  ;;  %v456_v9 = vrot.slane %v1610_v5, 1 }
  0x1a   : > { %v455_v6 = vrot.slane %v1605_v2, 1  ;;  %v450_v10 = vrot.slane %v1614_v7, 1  ;;  %v451_v11 = vrot.slane %v1617_v8, 1  ;;  %v1623_v12 = vld [vmem:[%s1596_s8 + $0x40] sm:$0x3]  ;;  %v1657_v25 = vld [vmem:[%s1596_s8 + $0x68] sm:$0xff] }
  0x1b   : > { %v1626_v13 = vsel %vm449_vm0, %v460_v3, %v461_v4  ;;  %v1629_v14 = vld [vmem:[%s1596_s8 + $0x28] sm:$0x3]  ;;  %v1632_v15 = vld [vmem:[%s1596_s8 + $0x10] sm:$0x3]  ;;  %v463_v18 = vrot.slane %v1623_v12, 1  ;;  %v1654_v24 = vld [vmem:[%s1596_s8 + $0x60] sm:$0xff] }
  0x1c   : > { %565 = vrot.lane.b32.xlu2 %v1626_v13, %s1512_s9  ;;  %v1637_v16 = vsel %vm449_vm0, %v455_v6, %v456_v9  ;;  %v452_v17 = vsel %vm449_vm0, %v450_v10, %v451_v11  ;;  %v458_v19 = vrot.slane %v1629_v14, 1  ;;  %v453_v20 = vrot.slane %v1632_v15, 1  ;;  %v1660_v26 = vld [vmem:[%s1596_s8 + $0x50] sm:$0xff]  ;;  %v1663_v27 = vld [vmem:[%s1596_s8 + $0x58] sm:$0x3]  ;;  %v1666_v28 = vld [vmem:[%s1596_s8 + $0x48] sm:$0xff] }
  0x1d   : > { %561 = vrot.lane.b32.xlu1 %v1637_v16, %s1512_s9  ;;  %557 = vrot.lane.b32.xlu0 %v452_v17, %s1512_s9  ;;  %v1647_v21 = vsel %vm449_vm0, %v461_v4, %v463_v18  ;;  %2487 = vst [vmem:[#allocation2_spill] sm:$0xff] %v1660_v26  ;;  %v470_v29 = vrot.slane %v1654_v24, 1  ;;  %v471_v30 = vrot.slane %v1657_v25, 1  ;;  %v466_v31 = vrot.slane %v1660_v26, 1  ;;  %v1688_v37 = vld [vmem:[%s1596_s8 + $0x80] sm:$0xff]  ;;  %v1694_v39 = vld [vmem:[%s1596_s8 + $0x78] sm:$0xff] }
  0x1e   : > { %v1650_v22 = vsel %vm449_vm0, %v456_v9, %v458_v19  ;;  %v454_v23 = vsel %vm449_vm0, %v451_v11, %v453_v20  ;;  %v468_v32 = vrot.slane %v1663_v27, 1  ;;  %v465_v33 = vrot.slane %v1666_v28, 1  ;;  %v1691_v38 = vld [vmem:[%s1596_s8 + $0x88] sm:$0x3]  ;;  %v1697_v40 = vld [vmem:[%s1596_s8 + $0x70] sm:$0x3] }
  0x1f   : > { %v1679_v34 = vsel %vm449_vm0, %v470_v29, %v471_v30  ;;  %v476_v41 = vrot.slane %v1688_v37, 1  ;;  %v478_v42 = vrot.slane %v1691_v38, 1  ;;  %v475_v43 = vrot.slane %v1694_v39, 1  ;;  %v1719_v48 = vld [vmem:[%s1596_s8 + $0xa8] sm:$0xff]  ;;  %v1722_v49 = vld [vmem:[%s1596_s8 + $0xb0] sm:$0xff]  ;;  %v1725_v50 = vld [vmem:[%s1596_s8 + $0x98] sm:$0xff] }
  0x20   : > { %v1682_v35 = vsel %vm449_vm0, %v466_v31, %v468_v32  ;;  %v1685_v36 = vsel %vm449_vm0, %v465_v33, %v466_v31  ;;  %v473_v44 = vrot.slane %v1697_v40, 1  ;;  %v1728_v51 = vld [vmem:[%s1596_s8 + $0xa0] sm:$0x3]  ;;  %v1731_v52 = vld [vmem:[%s1596_s8 + $0x90] sm:$0xff]  ;;  %v485_v53 = vrot.slane %v1719_v48, 1  ;;  %s1421_s14 = smul.u32 3, %s362_s13 }
  0x21   : > { %2488 = vst [vmem:[#allocation3_spill] sm:$0xff] %v1682_v35  ;;  %v1710_v45 = vsel %vm449_vm0, %v476_v41, %v478_v42  ;;  %v1713_v46 = vsel %vm449_vm0, %v475_v43, %v476_v41  ;;  %v486_v54 = vrot.slane %v1722_v49, 1  ;;  %v481_v55 = vrot.slane %v1725_v50, 1  ;;  %v1754_v61 = vld [vmem:[%s1596_s8 + $0xb8] sm:$0x3]  ;;  %s1519_s7 = smov 32  }
  0x22   : > { %2489 = vst [vmem:[#allocation4_spill] sm:$0xff] %v1710_v45  ;;  %v1716_v47 = vsel %vm449_vm0, %v471_v30, %v473_v44  ;;  %v483_v56 = vrot.slane %v1728_v51, 1  ;;  %v480_v57 = vrot.slane %v1731_v52, 1  ;;  %v492_v62 = vrot.slane %v1617_v8, 2  ;;  %s365_s15 = sadd.s32 %s1421_s14, %s1590_s27  ;;  %s372_s8 = sadd.s32 1, %s1875_s12 }
  0x23   : > { %v1745_v58 = vsel %vm449_vm0, %v485_v53, %v486_v54  ;;  %v494_v63 = vrot.slane %v1632_v15, 2  ;;  %v491_v3 = vrot.slane %v1614_v7, 2  ;;  %v488_v4 = vrot.slane %v1754_v61, 1  ;;  %s1367_s16 = sshll.u32 %s365_s15, 3  ;;  %p375_p8 = scmp.lt.s32.totalorder %s372_s8, 17 }
  0x24   : > { %567 = vrot.lane.b32.xlu2 %v1647_v21, %s1512_s9  ;;  %v1748_v59 = vsel %vm449_vm0, %v481_v55, %v483_v56  ;;  %v1751_v60 = vsel %vm449_vm0, %v480_v57, %v481_v55  ;;  %v501_v11 = vrot.slane %v1599_v0, 2  ;;  %v502_v15 = vrot.slane %v1602_v1, 2  ;;  %s1907_s26 = scalar_lea.vmem %s2479_s1, %s1367_s16 }
  0x25   : > { %563 = vrot.lane.b32.xlu1 %v1650_v22, %s1512_s9  ;;  %559 = vrot.lane.b32.xlu0 %v454_v23, %s1512_s9  ;;  %v495_v6 = vsel %vm490_vm1, %v492_v62, %v494_v63  ;;  %v493_v9 = vsel %vm490_vm1, %v491_v3, %v492_v62  ;;  %v1769_v10 = vsel %vm449_vm0, %v486_v54, %v488_v4  ;;  %v497_v17 = vrot.slane %v1610_v5, 2  ;;  %s2506_s8 = smov (!%p375_p8, %s372_s8), 17 }
  0x26   : > { %v499_v18 = vrot.slane %v1629_v14, 2  ;;  %v496_v19 = vrot.slane %v1605_v2, 2  ;;  %v1781_v20 = vsel %vm490_vm1, %v501_v11, %v502_v15  ;;  %v507_v14 = vrot.slane %v1660_v26, 2 }
  0x27   : > { %v509_v30 = vrot.slane %v1663_v27, 2  ;;  %v506_v31 = vrot.slane %v1666_v28, 2  ;;  %v504_v32 = vrot.slane %v1623_v12, 2  ;;  %v516_v12 = vrot.slane %v1694_v39, 2 }
  0x28   : > { %v1784_v23 = vsel %vm490_vm1, %v497_v17, %v499_v18  ;;  %v1787_v29 = vsel %vm490_vm1, %v496_v19, %v497_v17  ;;  %v517_v27 = vrot.slane %v1688_v37, 2  ;;  %v512_v43 = vrot.slane %v1657_v25, 2 }
  0x29   : > { %v1800_v33 = vsel %vm490_vm1, %v507_v14, %v509_v30  ;;  %v1803_v41 = vsel %vm490_vm1, %v506_v31, %v507_v14  ;;  %v1806_v42 = vsel %vm490_vm1, %v502_v15, %v504_v32  ;;  %v514_v44 = vrot.slane %v1697_v40, 2  ;;  %v1910_v31 = vld [vmem:[%s1907_s26 + $0x8] sm:$0xff]  ;;  %v1913_v32 = vld [vmem:[%s1907_s26] sm:$0xff] }
  0x2a   : > { %v511_v53 = vrot.slane %v1654_v24, 2  ;;  %v1820_v54 = vsel %vm490_vm1, %v516_v12, %v517_v27  ;;  %v522_v40 = vrot.slane %v1725_v50, 2  ;;  %v524_v57 = vrot.slane %v1728_v51, 2 }
  0x2b   : > { %v1823_v55 = vsel %vm490_vm1, %v512_v43, %v514_v44  ;;  %v521_v62 = vrot.slane %v1731_v52, 2  ;;  %v519_v63 = vrot.slane %v1691_v38, 2  ;;  %v527_v38 = vrot.slane %v1722_v49, 2 }
  0x2c   : > { %573 = vrot.lane.b32.xlu2 %v1679_v34, %s1512_s9  ;;  %v1826_v56 = vsel %vm490_vm1, %v511_v53, %v512_v43  ;;  %v1839_v3 = vsel %vm490_vm1, %v522_v40, %v524_v57  ;;  %v529_v51 = vrot.slane %v1754_v61, 2 }
  0x2d   : > { %571 = vrot.lane.b32.xlu1 %v1682_v35, %s1512_s9  ;;  %569 = vrot.lane.b32.xlu0 %v1685_v36, %s1512_s9  ;;  %v1842_v4 = vsel %vm490_vm1, %v521_v62, %v522_v40 }
  0x2e   : > { %v1857_v11 = vsel %vm490_vm1, %v527_v38, %v529_v51 }
  0x34   : > { %579 = vrot.lane.b32.xlu2 %v1710_v45, %s1512_s9 }
  0x35   : > { %577 = vrot.lane.b32.xlu1 %v1713_v46, %s1512_s9  ;;  %575 = vrot.lane.b32.xlu0 %v1716_v47, %s1512_s9 }
  0x3c   : > { %585 = vrot.lane.b32.xlu2 %v1745_v58, %s1512_s9 }
  0x3d   : > { %583 = vrot.lane.b32.xlu1 %v1748_v59, %s1512_s9  ;;  %581 = vrot.lane.b32.xlu0 %v1751_v60, %s1512_s9 }
  0x44   : > { %607 = vrot.lane.b32.xlu2 %v495_v6, %s1513_s10  ;;  %v1845_v6 = vsel %vm490_vm1, %v517_v27, %v519_v63 }
  0x45   : > { %605 = vrot.lane.b32.xlu1 %v493_v9, %s1513_s10  ;;  %587 = vrot.lane.b32.xlu0 %v1769_v10, %s1512_s9  ;;  %v526_v9 = vrot.slane %v1719_v48, 2  ;;  %s1422_s9 = smul.u32 3, %s2506_s8 }
  0x47   : > { %v1860_v15 = vsel %vm490_vm1, %v526_v9, %v527_v38 }
  0x4c   : > { %613 = vrot.lane.b32.xlu2 %v1781_v20, %s1513_s10 }
  0x4d   : > { %611 = vrot.lane.b32.xlu1 %v1784_v23, %s1513_s10  ;;  %609 = vrot.lane.b32.xlu0 %v1787_v29, %s1513_s10 }
  0x54   : > { %619 = vrot.lane.b32.xlu2 %v1800_v33, %s1513_s10 }
  0x55   : > { %617 = vrot.lane.b32.xlu1 %v1803_v41, %s1513_s10  ;;  %615 = vrot.lane.b32.xlu0 %v1806_v42, %s1513_s10 }
  0x5c   : > { %625 = vrot.lane.b32.xlu2 %v1820_v54, %s1513_s10 }
  0x5d   : > { %623 = vrot.lane.b32.xlu1 %v1823_v55, %s1513_s10  ;;  %621 = vrot.lane.b32.xlu0 %v1826_v56, %s1513_s10 }
  0x64   : > { %631 = vrot.lane.b32.xlu2 %v1839_v3, %s1513_s10 }
  0x65   : > { %629 = vrot.lane.b32.xlu1 %v1842_v4, %s1513_s10  ;;  %627 = vrot.lane.b32.xlu0 %v1845_v6, %s1513_s10 }
  0x6c   : > { %653 = vrot.lane.b32.xlu2 %v1605_v2, %s1514_s11 }
  0x6d   : > { %635 = vrot.lane.b32.xlu1 %v1857_v11, %s1513_s10  ;;  %633 = vrot.lane.b32.xlu0 %v1860_v15, %s1513_s10  ;;  %s379_s10 = sadd.s32 %s1422_s9, %s1590_s27 }
  0x74   : > { %659 = vrot.lane.b32.xlu2 %v1602_v1, %s1514_s11 }
  0x75   : > { %657 = vrot.lane.b32.xlu1 %v1599_v0, %s1514_s11  ;;  %655 = vrot.lane.b32.xlu0 %v1610_v5, %s1514_s11 }
  0x76   : > { %v566_v61 = vpop.permute.xlu2 %565 }
  0x7c   : > { %665 = vrot.lane.b32.xlu2 %v1654_v24, %s1514_s11 }
  0x7d   : > { %663 = vrot.lane.b32.xlu1 %v1660_v26, %s1514_s11  ;;  %661 = vrot.lane.b32.xlu0 %v1666_v28, %s1514_s11 }
  0x7e   : > { %v1884_v17 = vpop.permute.xlu2 %567 }
  0x84   : > { %671 = vrot.lane.b32.xlu2 %v1688_v37, %s1514_s11 }
  0x85   : > { %669 = vrot.lane.b32.xlu1 %v1694_v39, %s1514_s11  ;;  %667 = vrot.lane.b32.xlu0 %v1657_v25, %s1514_s11 }
  0x86   : > { %v1893_v18 = vpop.permute.xlu2 %573 }
  0x8c   : > { %677 = vrot.lane.b32.xlu2 %v1719_v48, %s1514_s11 }
  0x8d   : > { %675 = vrot.lane.b32.xlu1 %v1725_v50, %s1514_s11  ;;  %673 = vrot.lane.b32.xlu0 %v1731_v52, %s1514_s11 }
  0x8e   : > { %v1902_v19 = vpop.permute.xlu2 %579 }
  0x8f   : > { %v562_v14 = vpop.permute.xlu1 %561  ;;  %v558_v30 = vpop.permute.xlu0 %557 }
  0x94   : > { %683 = vrot.lane.b32.xlu2 %v1910_v31, %s1514_s11 }
  0x95   : > { %681 = vrot.lane.b32.xlu1 %v1913_v32, %s1514_s11  ;;  %679 = vrot.lane.b32.xlu0 %v1722_v49, %s1514_s11  ;;  %s1369_s11 = sshll.u32 %s379_s10, 3 }
  0x96   : > { %v1921_v12 = vpop.permute.xlu2 %585  ;;  %s2180_s14 = scalar_lea.vmem %s2480_s2, %s1369_s11 }
  0x97   : > { %v564_v27 = vpop.permute.xlu1 %563  ;;  %v560_v43 = vpop.permute.xlu0 %559 }
  0x98   : > { %v943_v44 = vsel %vm941_vm3, %v1617_v8, %v560_v43 }
  0x9c   : > { %705 = vrot.lane.b32.xlu2 %v1626_v13, %s1515_s28 }
  0x9d   : > { %703 = vrot.lane.b32.xlu1 %v1650_v22, %s1515_s28  ;;  %701 = vrot.lane.b32.xlu0 %v1637_v16, %s1515_s28  ;;  %v946_v16 = vsel %vm941_vm3, %v1599_v0, %v566_v61 }
  0x9e   : > { %v608_v53 = vpop.permute.xlu2 %607 }
  0x9f   : > { %v572_v40 = vpop.permute.xlu1 %571  ;;  %v1932_v57 = vsel %vm958_vm2, %v943_v44, %v608_v53  ;;  %v570_v62 = vpop.permute.xlu0 %569 }
  0xa0   : > { %v949_v51 = vsel %vm941_vm3, %v1660_v26, %v572_v40  ;;  %v942_v40 = vsel %vm941_vm3, %v1614_v7, %v558_v30 }
  0xa4   : > { %711 = vrot.lane.b32.xlu2 %v1682_v35, %s1515_s28 }
  0xa5   : > { %709 = vrot.lane.b32.xlu1 %v1685_v36, %s1515_s28  ;;  %707 = vrot.lane.b32.xlu0 %v1647_v21, %s1515_s28 }
  0xa6   : > { %v614_v22 = vpop.permute.xlu2 %613 }
  0xa7   : > { %v578_v8 = vpop.permute.xlu1 %577  ;;  %v1943_v63 = vsel %vm958_vm2, %v946_v16, %v614_v22  ;;  %v576_v38 = vpop.permute.xlu0 %575 }
  0xa8   : > { %v952_v53 = vsel %vm941_vm3, %v1694_v39, %v578_v8  ;;  %v944_v8 = vsel %vm941_vm3, %v1605_v2, %v562_v14  ;;  %v539_v2 = vrot.slane %v1913_v32, 2 }
  0xac   : > { %717 = vrot.lane.b32.xlu2 %v1713_v46, %s1515_s28 }
  0xad   : > { %715 = vrot.lane.b32.xlu1 %v1716_v47, %s1515_s28  ;;  %713 = vrot.lane.b32.xlu0 %v1679_v34, %s1515_s28 }
  0xae   : > { %v620_v9 = vpop.permute.xlu2 %619 }
  0xaf   : > { %v584_v61 = vpop.permute.xlu1 %583  ;;  %v1954_v43 = vsel %vm958_vm2, %v949_v51, %v620_v9  ;;  %v582_v44 = vpop.permute.xlu0 %581 }
  0xb0   : > { %v955_v7 = vsel %vm941_vm3, %v1725_v50, %v584_v61  ;;  %v535_v61 = vrot.slane %v1910_v31, 1 }
  0xb4   : > { %723 = vrot.lane.b32.xlu2 %v1748_v59, %s1515_s28 }
  0xb5   : > { %721 = vrot.lane.b32.xlu1 %v1751_v60, %s1515_s28  ;;  %719 = vrot.lane.b32.xlu0 %v1710_v45, %s1515_s28 }
  0xb6   : > { %v626_v16 = vpop.permute.xlu2 %625 }
  0xb7   : > { %v1967_v22 = vsel %vm958_vm2, %v952_v53, %v626_v16  ;;  %v606_v51 = vpop.permute.xlu1 %605  ;;  %v1969_v9 = vpop.permute.xlu0 %587  ;;  %v945_v53 = vsel %vm941_vm3, %v1610_v5, %v564_v27  ;;  %v540_v5 = vrot.slane %v1910_v31, 2  ;;  %v534_v27 = vrot.slane %v1913_v32, 1 }
  0xb8   : > { %v959_v35 = vsel %vm958_vm2, %v942_v40, %v606_v51 }
  0xbc   : > { %773 = vrot.lane.b32.xlu2 %v1860_v15, %s1516_s29 }
  0xbd   : > { %765 = vrot.lane.b32.xlu1 %v1820_v54, %s1516_s29  ;;  %725 = vrot.lane.b32.xlu0 %v1745_v58, %s1515_s28 }
  0xbe   : > { %v632_v30 = vpop.permute.xlu2 %631 }
  0xbf   : > { %v1985_v16 = vsel %vm958_vm2, %v955_v7, %v632_v30  ;;  %v612_v40 = vpop.permute.xlu1 %611  ;;  %v610_v51 = vpop.permute.xlu0 %609  ;;  %v948_v7 = vsel %vm941_vm3, %v1666_v28, %v570_v62  ;;  %v950_v62 = vsel %vm941_vm3, %v1654_v24, %v1893_v18 }
  0xc0   : > { %v962_v45 = vsel %vm958_vm2, %v945_v53, %v612_v40  ;;  %v1989_v26 = vsel %vm958_vm2, %v944_v8, %v610_v51 }
  0xc4   : > { %861 = vrot.lane.b32.xlu2 %v1751_v60, %s1517_s30  ;;  %v947_v60 = vsel %vm941_vm3, %v1602_v1, %v1884_v17  ;;  %v2019_v17 = vsel %vm449_vm0, %v534_v27, %v535_v61 }
  0xc5   : > { %821 = vrot.lane.b32.xlu1 %v1913_v32, %s1518_s6  ;;  %813 = vrot.lane.b32.xlu0 %v1731_v52, %s1518_s6  ;;  %v2014_v32 = vsel %vm490_vm1, %v539_v2, %v540_v5  ;;  %v951_v2 = vsel %vm941_vm3, %v1657_v25, %v576_v38  ;;  %v954_v38 = vsel %vm941_vm3, %v1731_v52, %v582_v44 }
  0xc6   : > { %v654_v14 = vpop.permute.xlu2 %653  ;;  %v956_v52 = vsel %vm941_vm3, %v1719_v48, %v1921_v12 }
  0xc7   : > { %v2007_v30 = vsel %vm975_vm4, %v959_v35, %v654_v14  ;;  %v618_v8 = vpop.permute.xlu1 %617  ;;  %v616_v53 = vpop.permute.xlu0 %615 }
  0xc8   : > { %v965_v40 = vsel %vm958_vm2, %v948_v7, %v618_v8  ;;  %v964_v51 = vsel %vm958_vm2, %v947_v60, %v616_v53 }
  0xcc   : > { %917 = vrot.lane.b32.xlu2 %v2014_v32, %s1519_s7 }
  0xcd   : > { %909 = vrot.lane.b32.xlu1 %v1842_v4, %s1519_s7  ;;  %869 = vrot.lane.b32.xlu0 %v2019_v17, %s1517_s30 }
  0xce   : > { %v660_v35 = vpop.permute.xlu2 %659 }
  0xcf   : > { %v2033_v14 = vsel %vm975_vm4, %v962_v45, %v660_v35  ;;  %v624_v27 = vpop.permute.xlu1 %623  ;;  %v622_v60 = vpop.permute.xlu0 %621  ;;  %v953_v45 = vsel %vm941_vm3, %v1688_v37, %v1902_v19  ;;  %v957_v19 = vsel %vm941_vm3, %v1722_v49, %v1969_v9 }
  0xd0   : > { %v968_v7 = vsel %vm958_vm2, %v951_v2, %v624_v27  ;;  %v967_v8 = vsel %vm958_vm2, %v950_v62, %v622_v60 }
  0xd4   : > { %727 = vrot.lane.b32.xlu2 %v1769_v10, %s1515_s28 }
  0xd5   : > { %757 = vrot.lane.b32.xlu1 %v1803_v41, %s1516_s29  ;;  %749 = vrot.lane.b32.xlu0 %v1787_v29, %s1516_s29 }
  0xd6   : > { %v666_v18 = vpop.permute.xlu2 %665 }
  0xd7   : > { %v2049_v53 = vsel %vm975_vm4, %v965_v40, %v666_v18  ;;  %v630_v35 = vpop.permute.xlu1 %629  ;;  %v628_v62 = vpop.permute.xlu0 %627 }
  0xd8   : > { %v971_v2 = vsel %vm958_vm2, %v954_v38, %v630_v35  ;;  %v970_v27 = vsel %vm958_vm2, %v953_v45, %v628_v62  ;;  %v421_v35 = vld [vmem:[%s1907_s26 + $0x10] sm:$0x3] }
  0xdc   : > { %767 = vrot.lane.b32.xlu2 %v1845_v6, %s1516_s29 }
  0xdd   : > { %805 = vrot.lane.b32.xlu1 %v1654_v24, %s1518_s6  ;;  %797 = vrot.lane.b32.xlu0 %v1599_v0, %s1518_s6 }
  0xde   : > { %v672_v29 = vpop.permute.xlu2 %671 }
  0xdf   : > { %v2066_v44 = vsel %vm975_vm4, %v968_v7, %v672_v29  ;;  %v636_v40 = vpop.permute.xlu1 %635  ;;  %v634_v60 = vpop.permute.xlu0 %633 }
  0xe0   : > { %v974_v24 = vsel %vm958_vm2, %v957_v19, %v636_v40  ;;  %v973_v18 = vsel %vm958_vm2, %v956_v52, %v634_v60 }
  0xe4   : > { %853 = vrot.lane.b32.xlu2 %v1679_v34, %s1517_s30 }
  0xe5   : > { %845 = vrot.lane.b32.xlu1 %v1626_v13, %s1517_s30  ;;  %775 = vrot.lane.b32.xlu0 %v1857_v11, %s1516_s29  ;;  %v537_v13 = vrot.slane %v421_v35, 1 }
  0xe6   : > { %v678_v0 = vpop.permute.xlu2 %677 }
  0xe7   : > { %v2077_v12 = vsel %vm975_vm4, %v971_v2, %v678_v0  ;;  %v658_v9 = vpop.permute.xlu1 %657  ;;  %v656_v7 = vpop.permute.xlu0 %655  ;;  %v2099_v52 = vsel %vm449_vm0, %v535_v61, %v537_v13  ;;  %v422_v13 = vld [vmem:[%s2180_s14] sm:$0xff] }
  0xe8   : > { %v978_v45 = vsel %vm975_vm4, %v1989_v26, %v658_v9  ;;  %v977_v38 = vsel %vm975_vm4, %v1932_v57, %v656_v7 }
  0xec   : > { %893 = vrot.lane.b32.xlu2 %v1781_v20, %s1519_s7 }
  0xed   : > { %823 = vrot.lane.b32.xlu1 %v1910_v31, %s1518_s6  ;;  %815 = vrot.lane.b32.xlu0 %v1725_v50, %s1518_s6 }
  0xee   : > { %v684_v34 = vpop.permute.xlu2 %683 }
  0xef   : > { %v2091_v62 = vsel %vm975_vm4, %v974_v24, %v684_v34  ;;  %v664_v2 = vpop.permute.xlu1 %663  ;;  %v662_v26 = vpop.permute.xlu0 %661  ;;  %v2200_v34 = vld [vmem:[%s2180_s14 + $0x8] sm:$0xff] }
  0xf0   : > { %v981_v29 = vsel %vm975_vm4, %v964_v51, %v664_v2  ;;  %v980_v57 = vsel %vm975_vm4, %v1943_v63, %v662_v26  ;;  %v542_v51 = vrot.slane %v421_v35, 2  ;;  %v547_v2 = vrot.slane %v422_v13, 1 }
  0xf4   : > { %871 = vrot.lane.b32.xlu2 %v2099_v52, %s1517_s30 }
  0xf5   : > { %863 = vrot.lane.b32.xlu1 %v1748_v59, %s1517_s30  ;;  %901 = vrot.lane.b32.xlu0 %v1826_v56, %s1519_s7  ;;  %v2120_v59 = vsel %vm490_vm1, %v540_v5, %v542_v51  ;;  %v1077_v51 = vld [vmem:[%s2481_s3] sm:$0xff] }
  0xf6   : > { %v706_v50 = vpop.permute.xlu2 %705 }
  0xf7   : > { %v2108_v63 = vsel %vm992_vm5, %v978_v45, %v706_v50  ;;  %v670_v19 = vpop.permute.xlu1 %669  ;;  %v668_v40 = vpop.permute.xlu0 %667 }
  0xf8   : > { %v2111_v61 = vsel %vm975_vm4, %v967_v8, %v670_v19  ;;  %v2115_v60 = vsel %vm975_vm4, %v1954_v43, %v668_v40 }
  0xfc   : > { %751 = vrot.lane.b32.xlu2 %v1784_v23, %s1516_s29 }
  0xfd   : > { %919 = vrot.lane.b32.xlu1 %v2120_v59, %s1519_s7  ;;  %911 = vrot.lane.b32.xlu0 %v1839_v3, %s1519_s7 }
  0xfe   : > { %v712_v8 = vpop.permute.xlu2 %711 }
  0xff   : > { %v2129_v24 = vsel %vm992_vm5, %v981_v29, %v712_v8  ;;  %v676_v43 = vpop.permute.xlu1 %675  ;;  %v674_v0 = vpop.permute.xlu0 %673  ;;  %v548_v29 = vrot.slane %v2200_v34, 1 }
 0x100   : > { %v987_v31 = vsel %vm975_vm4, %v970_v27, %v676_v43  ;;  %v2134_v5 = vsel %vm975_vm4, %v1967_v22, %v674_v0  ;;  %v553_v43 = vrot.slane %v2200_v34, 2 }
 0x101   : > { %v549_v8 = vsel %vm449_vm0, %v547_v2, %v548_v29 }
 0x104   : > { %799 = vrot.lane.b32.xlu2 %v1602_v1, %s1518_s6 }
 0x105   : > { %729 = vrot.lane.b32.xlu1 %v2019_v17, %s1515_s28  ;;  %759 = vrot.lane.b32.xlu0 %v1800_v33, %s1516_s29 }
 0x106   : > { %v2143_v23 = vpop.permute.xlu2 %717 }
 0x107   : > { %v682_v9 = vpop.permute.xlu1 %681  ;;  %v680_v27 = vpop.permute.xlu0 %679 }
 0x108   : > { %v2146_v7 = vsel %vm975_vm4, %v973_v18, %v682_v9  ;;  %v2150_v22 = vsel %vm975_vm4, %v1985_v16, %v680_v27 }
 0x10c   : > { %777 = vrot.lane.b32.xlu2 %v2014_v32, %s1516_s29 }
 0x10d   : > { %769 = vrot.lane.b32.xlu1 %v1842_v4, %s1516_s29  ;;  %807 = vrot.lane.b32.xlu0 %v1657_v25, %s1518_s6 }
 0x10e   : > { %v724_v1 = vpop.permute.xlu2 %723 }
 0x10f   : > { %v2159_v17 = vsel %vm992_vm5, %v987_v31, %v724_v1  ;;  %v704_v18 = vpop.permute.xlu1 %703  ;;  %v702_v45 = vpop.permute.xlu0 %701 }
 0x110   : > { %v2162_v16 = vsel %vm992_vm5, %v977_v38, %v704_v18  ;;  %v2166_v35 = vsel %vm992_vm5, %v2007_v30, %v702_v45  ;;  %v1080_v30 = vld [vmem:[%s2481_s3 + $0x18] sm:$0xff]  ;;  %v1079_v38 = vld [vmem:[%s2481_s3 + $0x10] sm:$0xff] }
 0x114   : > { %817 = vrot.lane.b32.xlu2 %v1719_v48, %s1518_s6  ;;  %v1081_v48 = vld [vmem:[%s2481_s3 + $0x20] sm:$0xf] }
 0x115   : > { %855 = vrot.lane.b32.xlu1 %v1716_v47, %s1517_s30  ;;  %847 = vrot.lane.b32.xlu0 %v1647_v21, %s1517_s30 }
 0x116   : > { %v2175_v25 = vpop.permute.xlu2 %773  ;;  %1405 = vmatpush.msk.msra.mxu2 %vm1135_vm6, %v1081_v48  ;;  %1406 = vmatpush.msk.msra.mxu3 %vm1135_vm6, %v1081_v48 }
 0x117   : > { %v710_v4 = vpop.permute.xlu1 %709  ;;  %v708_v32 = vpop.permute.xlu0 %707  ;;  %1373 = vmatpush.msk.msra.mxu0 %vm1135_vm6, %v1081_v48  ;;  %1404 = vmatpush.msk.msra.mxu1 %vm1135_vm6, %v1081_v48 }
 0x118   : > { %v2186_v47 = vsel %vm992_vm5, %v980_v57, %v710_v4  ;;  %v2190_v21 = vsel %vm992_vm5, %v2033_v14, %v708_v32  ;;  %1408 = vmatpush.msra.mxu2 %v1080_v30  ;;  %1409 = vmatpush.msra.mxu3 %v1080_v30  ;;  %v1078_v14 = vld [vmem:[%s2481_s3 + $0x8] sm:$0xff] }
 0x119   : > { %1151 = vmatpush.msra.mxu0 %v1080_v30  ;;  %1407 = vmatpush.msra.mxu1 %v1080_v30 }
 0x11a   : > { %1411 = vmatpush.msra.mxu2 %v1079_v38  ;;  %1412 = vmatpush.msra.mxu3 %v1079_v38 }
 0x11b   : > { %1152 = vmatpush.msra.mxu0 %v1079_v38  ;;  %1410 = vmatpush.msra.mxu1 %v1079_v38  ;;  %v424_v38 = vld [vmem:[%s2180_s14 + $0x10] sm:$0x3] }
 0x11c   : > { %903 = vrot.lane.b32.xlu2 %v1823_v55, %s1519_s7  ;;  %1414 = vmatpush.msra.mxu2 %v1078_v14 }
 0x11d   : > { %895 = vrot.lane.b32.xlu1 %v1806_v42, %s1519_s7  ;;  %825 = vrot.lane.b32.xlu0 %v422_v13, %s1518_s6 }
 0x11e   : > { %v862_v26 = vpop.permute.xlu2 %861  ;;  %1415 = vmatpush.msra.mxu3 %v1078_v14  ;;  %1417 = vmatpush.msra.mxu2 %v1077_v51 }
 0x11f   : > { %v716_v57 = vpop.permute.xlu1 %715  ;;  %v714_v50 = vpop.permute.xlu0 %713  ;;  %1153 = vmatpush.msra.mxu0 %v1078_v14  ;;  %1413 = vmatpush.msra.mxu1 %v1078_v14  ;;  %v550_v14 = vrot.slane %v424_v38, 1 }
 0x120   : > { %v2216_v19 = vsel %vm992_vm5, %v2115_v60, %v716_v57  ;;  %v2220_v40 = vsel %vm992_vm5, %v2049_v53, %v714_v50  ;;  %1418 = vmatpush.msra.mxu3 %v1077_v51  ;;  %v552_v53 = vrot.slane %v422_v13, 2  ;;  %v555_v13 = vrot.slane %v424_v38, 2 }
 0x121   : > { %1154 = vmatpush.msra.mxu0 %v1077_v51  ;;  %1416 = vmatpush.msra.mxu1 %v1077_v51  ;;  %v551_v57 = vsel %vm449_vm0, %v548_v29, %v550_v14 }
 0x124   : > { %913 = vrot.lane.b32.xlu2 %v1860_v15, %s1519_s7  ;;  %v554_v15 = vsel %vm490_vm1, %v552_v53, %v553_v43 }
 0x125   : > { %873 = vrot.lane.b32.xlu1 %v549_v8, %s1517_s30  ;;  %865 = vrot.lane.b32.xlu0 %v1745_v58, %s1517_s30  ;;  %v2490_v8 = vld [vmem:[#allocation2_spill] sm:$0xff] }
 0x126   : > { %v918_v60 = vpop.permute.xlu2 %917 }
 0x127   : > { %v722_v0 = vpop.permute.xlu1 %721  ;;  %v720_v31 = vpop.permute.xlu0 %719 }
 0x128   : > { %v2233_v9 = vsel %vm992_vm5, %v2134_v5, %v722_v0  ;;  %v2237_v27 = vsel %vm992_vm5, %v2066_v44, %v720_v31  ;;  %v2492_v0 = vld [vmem:[#allocation3_spill] sm:$0xff] }
 0x12c   : > { %761 = vrot.lane.b32.xlu2 %v1826_v56, %s1516_s29 }
 0x12d   : > { %753 = vrot.lane.b32.xlu1 %v1781_v20, %s1516_s29  ;;  %921 = vrot.lane.b32.xlu0 %v554_v15, %s1519_s7  ;;  %v1001_v20 = vsel %vm992_vm5, %v2111_v61, %v2143_v23 }
 0x12e   : > { %v2245_v58 = vpop.permute.xlu2 %727 }
 0x12f   : > { %v766_v1 = vpop.permute.xlu1 %765  ;;  %v726_v18 = vpop.permute.xlu0 %725 }
 0x130   : > { %v1018_v45 = vsel %vm1009_vm7, %v1001_v20, %v766_v1 }
 0x134   : > { %809 = vrot.lane.b32.xlu2 %v1694_v39, %s1518_s6  ;;  %v1005_v39 = vsel %vm992_vm5, %v2077_v12, %v726_v18 }
 0x135   : > { %801 = vrot.lane.b32.xlu1 %v1666_v28, %s1518_s6  ;;  %731 = vrot.lane.b32.xlu0 %v2099_v52, %s1515_s28  ;;  %v1022_v52 = vsel %vm1009_vm7, %v1005_v39, %v2175_v25  ;;  %s1370_s28 = sshll.u32 %s1494_s18, 4 }
 0x136   : > { %v2253_v44 = vpop.permute.xlu2 %767  ;;  %p388_p9 = scmp.lt.s32.totalorder %s1370_s28, 31 }
 0x137   : > { %v822_v56 = vpop.permute.xlu1 %821  ;;  %v814_v5 = vpop.permute.xlu0 %813 }
 0x138   : > { %v1035_v28 = vsel %vm1026_vm8, %v1018_v45, %v814_v5  ;;  %v1039_v12 = vsel %vm1026_vm8, %v1022_v52, %v822_v56  ;;  %s2508_s28 = smov (!%p388_p9, %s1370_s28), 31 }
 0x139   : > { %v1052_v32 = vsel %vm1043_vm9, %v1035_v28, %v862_v26  ;;  %v556_v26 = vsel %vm490_vm1, %v553_v43, %v555_v13  ;;  %v2491_v43 = vld [vmem:[#allocation4_spill] sm:$0xff] }
 0x13c   : > { %849 = vrot.lane.b32.xlu2 %v1685_v36, %s1517_s30 }
 0x13d   : > { %779 = vrot.lane.b32.xlu1 %v2120_v59, %s1516_s29  ;;  %771 = vrot.lane.b32.xlu0 %v1839_v3, %s1516_s29 }
 0x13e   : > { %v854_v61 = vpop.permute.xlu2 %853 }
 0x13f   : > { %v910_v23 = vpop.permute.xlu1 %909  ;;  %v870_v4 = vpop.permute.xlu0 %869 }
 0x140   : > { %v1056_v36 = vsel %vm1043_vm9, %v1039_v12, %v870_v4  ;;  %v1069_v59 = vsel %vm1060_vm10, %v1052_v32, %v910_v23 }
 0x141   : > { %1382 = vmatmul.msk.f32.vlgmr.msra.gmra.mxu2 %vm1086_vm11, %v1069_v59  ;;  %v1073_v3 = vsel %vm1060_vm10, %v1056_v36, %v918_v60 }
 0x142   : > { %1386 = vmatmul.msk.f32.vlgmr.msra.gmra.mxu3 %vm1086_vm11, %v1073_v3 }
 0x144   : > { %827 = vrot.lane.b32.xlu2 %v2200_v34, %s1518_s6 }
 0x145   : > { %819 = vrot.lane.b32.xlu1 %v1722_v49, %s1518_s6  ;;  %857 = vrot.lane.b32.xlu0 %v1713_v46, %s1517_s30 }
 0x146   : > { %v894_v30 = vpop.permute.xlu2 %893 }
 0x147   : > { %v758_v25 = vpop.permute.xlu1 %757  ;;  %v750_v48 = vpop.permute.xlu0 %749 }
 0x148   : > { %v1014_v53 = vsel %vm1009_vm7, %v2186_v47, %v758_v25  ;;  %v1006_v47 = vsel %vm992_vm5, %v2150_v22, %v2245_v58 }
 0x14c   : > { %867 = vrot.lane.b32.xlu2 %v1769_v10, %s1517_s30  ;;  %v1010_v10 = vsel %vm1009_vm7, %v2166_v35, %v750_v48 }
 0x14d   : > { %905 = vrot.lane.b32.xlu1 %v1820_v54, %s1519_s7  ;;  %897 = vrot.lane.b32.xlu0 %v1803_v41, %s1519_s7 }
 0x14e   : > { %v872_v46 = vpop.permute.xlu2 %871 }
 0x14f   : > { %v806_v2 = vpop.permute.xlu1 %805  ;;  %v798_v49 = vpop.permute.xlu0 %797 }
 0x150   : > { %v1027_v41 = vsel %vm1026_vm8, %v1010_v10, %v798_v49  ;;  %v1031_v60 = vsel %vm1026_vm8, %v1014_v53, %v806_v2 }
 0x154   : > { %923 = vrot.lane.b32.xlu2 %v556_v26, %s1519_s7 }
 0x155   : > { %915 = vrot.lane.b32.xlu1 %v1857_v11, %s1519_s7  ;;  %875 = vrot.lane.b32.xlu0 %v551_v57, %s1517_s30 }
 0x156   : > { %v752_v29 = vpop.permute.xlu2 %751 }
 0x157   : > { %v846_v54 = vpop.permute.xlu1 %845  ;;  %v776_v50 = vpop.permute.xlu0 %775  ;;  %v1011_v25 = vsel %vm1009_vm7, %v2162_v16, %v752_v29 }
 0x158   : > { %v1044_v51 = vsel %vm1043_vm9, %v1027_v41, %v846_v54  ;;  %v1023_v18 = vsel %vm1009_vm7, %v1006_v47, %v776_v50 }
 0x159   : > { %v1061_v34 = vsel %vm1060_vm10, %v1044_v51, %v894_v30 }
 0x15a   : > { %1374 = vmatmul.msk.f32.vlgmr.msra.gmra.mxu0 %vm1086_vm11, %v1061_v34 }
 0x15c   : > { %803 = vrot.lane.b32.xlu2 %v2490_v8, %s1518_s6 }
 0x15d   : > { %763 = vrot.lane.b32.xlu1 %v1823_v55, %s1516_s29  ;;  %755 = vrot.lane.b32.xlu0 %v1806_v42, %s1516_s29  ;;  %v1048_v42 = vsel %vm1043_vm9, %v1031_v60, %v854_v61  ;;  %s1371_s29 = sshll.u32 %s2504_s19, 5 }
 0x15e   : > { %v800_v55 = vpop.permute.xlu2 %799 }
 0x15f   : > { %v824_v11 = vpop.permute.xlu1 %823  ;;  %v816_v35 = vpop.permute.xlu0 %815  ;;  %v1028_v48 = vsel %vm1026_vm8, %v1011_v25, %v800_v55 }
 0x160   : > { %v1040_v56 = vsel %vm1026_vm8, %v1023_v18, %v824_v11 }
 0x161   : > { %v1057_v58 = vsel %vm1043_vm9, %v1040_v56, %v872_v46 }
 0x164   : > { %859 = vrot.lane.b32.xlu2 %v2491_v43, %s1517_s30 }
 0x165   : > { %851 = vrot.lane.b32.xlu1 %v2492_v0, %s1517_s30  ;;  %811 = vrot.lane.b32.xlu0 %v1688_v37, %s1518_s6  ;;  %v1019_v37 = vsel %vm1009_vm7, %v2237_v27, %v2253_v44  ;;  %s391_s30 = sadd.s32 %s1371_s29, %s2508_s28 }
 0x166   : > { %v1036_v5 = vsel %vm1026_vm8, %v1019_v37, %v816_v35  ;;  %v778_v39 = vpop.permute.xlu2 %777  ;;  %s1372_s18 = sshll.u32 %s391_s30, 3 }
 0x167   : > { %v864_v31 = vpop.permute.xlu1 %863  ;;  %v902_v15 = vpop.permute.xlu0 %901  ;;  %s2394_s13 = scalar_lea.vmem %s2483_s5, %s1372_s18 }
 0x168   : > { %v1065_v1 = vsel %vm1060_vm10, %v1048_v42, %v902_v15  ;;  %v1053_v20 = vsel %vm1043_vm9, %v1036_v5, %v864_v31 }
 0x169   : > { %1378 = vmatmul.msk.f32.vlgmr.msra.gmra.mxu1 %vm1086_vm11, %v1065_v1 }
 0x16d   : > { %907 = vrot.lane.b32.xlu1 %v1845_v6, %s1519_s7  ;;  %899 = vrot.lane.b32.xlu0 %v1800_v33, %s1519_s7 }
 0x16e   : > { %v818_v33 = vpop.permute.xlu2 %817 }
 0x16f   : > { %v920_v45 = vpop.permute.xlu1 %919  ;;  %v912_v22 = vpop.permute.xlu0 %911 }
 0x170   : > { %v1070_v28 = vsel %vm1060_vm10, %v1053_v20, %v912_v22  ;;  %v1074_v52 = vsel %vm1060_vm10, %v1057_v58, %v920_v45 }
 0x171   : > { %1383 = vmatmul.msk.f32.gmra.mxu2 %vm1086_vm11, %v1070_v28  ;;  %1387 = vmatmul.msk.f32.gmra.mxu3 %vm1086_vm11, %v1074_v52 }
 0x176   : > { %v904_v12 = vpop.permute.xlu2 %903 }
 0x177   : > { %v730_v6 = vpop.permute.xlu1 %729  ;;  %v760_v27 = vpop.permute.xlu0 %759 }
 0x178   : > { %v1015_v23 = vsel %vm1009_vm7, %v2129_v24, %v760_v27  ;;  %v1007_v41 = vsel %vm992_vm5, %v2146_v7, %v730_v6 }
 0x179   : > { %v1024_v54 = vsel %vm1009_vm7, %v1007_v41, %v778_v39 }
 0x17e   : > { %v914_v30 = vpop.permute.xlu2 %913 }
 0x17f   : > { %v770_v44 = vpop.permute.xlu1 %769  ;;  %v808_v61 = vpop.permute.xlu0 %807 }
 0x180   : > { %v1032_v4 = vsel %vm1026_vm8, %v1015_v23, %v808_v61  ;;  %v1020_v2 = vsel %vm1009_vm7, %v2233_v9, %v770_v44 }
 0x181   : > { %v1037_v26 = vsel %vm1026_vm8, %v1020_v2, %v818_v33 }
 0x186   : > { %v762_v57 = vpop.permute.xlu2 %761 }
 0x187   : > { %v856_v32 = vpop.permute.xlu1 %855  ;;  %v848_v36 = vpop.permute.xlu0 %847  ;;  %v1016_v42 = vsel %vm1009_vm7, %v2220_v40, %v762_v57  ;;  %v2383_v40 = vld [vmem:[%s2482_s4] ss:$0 sm:$0xff] }
 0x188   : > { %v1049_v59 = vsel %vm1043_vm9, %v1032_v4, %v856_v32  ;;  %v1045_v38 = vsel %vm1043_vm9, %v1028_v48, %v848_v36 }
 0x189   : > { %v1066_v3 = vsel %vm1060_vm10, %v1049_v59, %v904_v12 }
 0x18a   : > { %1379 = vmatmul.msk.f32.gmra.mxu1 %vm1086_vm11, %v1066_v3 }
 0x18e   : > { %v810_v8 = vpop.permute.xlu2 %809 }
 0x18f   : > { %v896_v13 = vpop.permute.xlu1 %895  ;;  %v826_v24 = vpop.permute.xlu0 %825  ;;  %v1033_v1 = vsel %vm1026_vm8, %v1016_v42, %v810_v8 }
 0x190   : > { %v1062_v14 = vsel %vm1060_vm10, %v1045_v38, %v896_v13  ;;  %v1041_v50 = vsel %vm1026_vm8, %v1024_v54, %v826_v24 }
 0x191   : > { %1375 = vmatmul.msk.f32.gmra.mxu0 %vm1086_vm11, %v1062_v14 }
 0x196   : > { %v850_v53 = vpop.permute.xlu2 %849 }
 0x197   : > { %v874_v49 = vpop.permute.xlu1 %873  ;;  %v866_v46 = vpop.permute.xlu0 %865 }
 0x198   : > { %v1054_v16 = vsel %vm1043_vm9, %v1037_v26, %v866_v46  ;;  %v1058_v9 = vsel %vm1043_vm9, %v1041_v50, %v874_v49 }
 0x199   : > { %v1071_v10 = vsel %vm1060_vm10, %v1054_v16, %v914_v30 }
 0x19a   : > { %1384 = vmatmul.msk.f32.gmra.mxu2 %vm1086_vm11, %v1071_v10 }
 0x19e   : > { %v828_v43 = vpop.permute.xlu2 %827 }
 0x19f   : > { %v754_v51 = vpop.permute.xlu1 %753  ;;  %v922_v34 = vpop.permute.xlu0 %921 }
 0x1a0   : > { %v1075_v29 = vsel %vm1060_vm10, %v1058_v9, %v922_v34  ;;  %v1012_v31 = vsel %vm1009_vm7, %v2108_v63, %v754_v51 }
 0x1a1   : > { %1388 = vmatmul.msk.f32.gmra.mxu3 %vm1086_vm11, %v1075_v29 }
 0x1a6   : > { %v868_v47 = vpop.permute.xlu2 %867 }
 0x1a7   : > { %v802_v11 = vpop.permute.xlu1 %801  ;;  %v732_v35 = vpop.permute.xlu0 %731 }
 0x1a8   : > { %v1029_v15 = vsel %vm1026_vm8, %v1012_v31, %v802_v11  ;;  %v1008_v45 = vsel %vm992_vm5, %v2091_v62, %v732_v35 }
 0x1a9   : > { %v1046_v18 = vsel %vm1043_vm9, %v1029_v15, %v850_v53 }
 0x1ae   : > { %v924_v27 = vpop.permute.xlu2 %923 }
 0x1af   : > { %v780_v7 = vpop.permute.xlu1 %779  ;;  %v772_v60 = vpop.permute.xlu0 %771 }
 0x1b0   : > { %v1021_v22 = vsel %vm1009_vm7, %v2159_v17, %v772_v60  ;;  %v1025_v58 = vsel %vm1009_vm7, %v1008_v45, %v780_v7 }
 0x1b1   : > { %v1042_v17 = vsel %vm1026_vm8, %v1025_v58, %v828_v43 }
 0x1b6   : > { %v804_v59 = vpop.permute.xlu2 %803 }
 0x1b7   : > { %v820_v0 = vpop.permute.xlu1 %819  ;;  %v858_v55 = vpop.permute.xlu0 %857 }
 0x1b8   : > { %v1050_v56 = vsel %vm1043_vm9, %v1033_v1, %v858_v55  ;;  %v1038_v39 = vsel %vm1026_vm8, %v1021_v22, %v820_v0 }
 0x1b9   : > { %v1055_v33 = vsel %vm1043_vm9, %v1038_v39, %v868_v47 }
 0x1be   : > { %v860_v14 = vpop.permute.xlu2 %859 }
 0x1bf   : > { %v906_v37 = vpop.permute.xlu1 %905  ;;  %v898_v5 = vpop.permute.xlu0 %897 }
 0x1c0   : > { %v1063_v20 = vsel %vm1060_vm10, %v1046_v18, %v898_v5  ;;  %v1067_v63 = vsel %vm1060_vm10, %v1050_v56, %v906_v37 }
 0x1c1   : > { %1376 = vmatmul.msk.f32.gmra.mxu0 %vm1086_vm11, %v1063_v20  ;;  %1380 = vmatmul.msk.f32.gmra.mxu1 %vm1086_vm11, %v1067_v63 }
 0x1c4   : > { %v1180_v28 = vpop.f32.mrf.mxu2 }
 0x1c5   : > { %v1181_v52 = vadd.f32 %v2383_v40, %v1180_v28  ;;  %v1192_v6 = vpop.f32.mrf.mxu3 }
 0x1c6   : > { %v1193_v62 = vadd.f32 %v2383_v40, %v1192_v6 }
 0x1c7   : > { %1212 = vst.msk [vmem:[%s2394_s13 + $0x40] sm:$0xff] %vm1060_vm10, %v1181_v52  ;;  %v916_v44 = vpop.permute.xlu1 %915  ;;  %v876_v61 = vpop.permute.xlu0 %875 }
 0x1c8   : > { %1216 = vst.msk [vmem:[%s2394_s13 + $0x60] sm:$0xff] %vm1060_vm10, %v1193_v62  ;;  %v1059_v12 = vsel %vm1043_vm9, %v1042_v17, %v876_v61  ;;  %v1072_v23 = vsel %vm1060_vm10, %v1055_v33, %v916_v44 }
 0x1c9   : > { %1385 = vmatmul.msk.f32.gmra.mxu2 %vm1086_vm11, %v1072_v23  ;;  %v1076_v4 = vsel %vm1060_vm10, %v1059_v12, %v924_v27 }
 0x1ca   : > { %1389 = vmatmul.msk.f32.gmra.mxu3 %vm1086_vm11, %v1076_v4 }
 0x1cf   : > { %v764_v32 = vpop.permute.xlu1 %763  ;;  %v756_v36 = vpop.permute.xlu0 %755 }
 0x1d0   : > { %v1017_v38 = vsel %vm1009_vm7, %v2216_v19, %v764_v32  ;;  %v1013_v13 = vsel %vm1009_vm7, %v2190_v21, %v756_v36 }
 0x1d1   : > { %v1030_v2 = vsel %vm1026_vm8, %v1013_v13, %v804_v59 }
 0x1d7   : > { %v852_v3 = vpop.permute.xlu1 %851  ;;  %v1156_v25 = vpop.f32.mrf.mxu0 }
 0x1d8   : > { %v1157_v48 = vadd.f32 %v2383_v40, %v1156_v25  ;;  %v812_v30 = vpop.permute.xlu0 %811  ;;  %v1047_v46 = vsel %vm1043_vm9, %v1030_v2, %v852_v3 }
 0x1d9   : > { %v1034_v24 = vsel %vm1026_vm8, %v1017_v38, %v812_v30 }
 0x1da   : > { %1204 = vst.msk [vmem:[%s2394_s13] sm:$0xff] %vm1060_vm10, %v1157_v48  ;;  %v1051_v49 = vsel %vm1043_vm9, %v1034_v24, %v860_v14 }
 0x1df   : > { %v908_v26 = vpop.permute.xlu1 %907 }
 0x1e0   : > { %v900_v57 = vpop.permute.xlu0 %899  ;;  %v1068_v16 = vsel %vm1060_vm10, %v1051_v49, %v908_v26 }
 0x1e1   : > { %v1064_v19 = vsel %vm1060_vm10, %v1047_v46, %v900_v57  ;;  %1381 = vmatmul.msk.f32.gmra.mxu1 %vm1086_vm11, %v1068_v16 }
 0x1e2   : > { %1377 = vmatmul.msk.f32.gmra.mxu0 %vm1086_vm11, %v1064_v19 }
 0x1e6   : > { %v1168_v21 = vpop.f32.mrf.mxu1 }
 0x1e7   : > { %v1169_v10 = vadd.f32 %v2383_v40, %v1168_v21 }
 0x1e9   : > { %1208 = vst.msk [vmem:[%s2394_s13 + $0x20] sm:$0xff] %vm1060_vm10, %v1169_v10 }
 0x1f4   : > { %v1183_v41 = vpop.f32.mrf.mxu2  ;;  %v1195_v54 = vpop.f32.mrf.mxu3 }
 0x1f5   : > { %v1184_v50 = vadd.f32 %v2383_v40, %v1183_v41  ;;  %v1196_v9 = vadd.f32 %v2383_v40, %v1195_v54 }
 0x1f7   : > { %1213 = vst.msk [vmem:[%s2394_s13 + $0x48] sm:$0xff] %vm1060_vm10, %v1184_v50 }
 0x1f8   : > { %1217 = vst.msk [vmem:[%s2394_s13 + $0x68] sm:$0xff] %vm1060_vm10, %v1196_v9 }
 0x207   : > { %v1171_v51 = vpop.f32.mrf.mxu1 }
 0x208   : > { %v1172_v34 = vadd.f32 %v2383_v40, %v1171_v51 }
 0x20a   : > { %1209 = vst.msk [vmem:[%s2394_s13 + $0x28] sm:$0xff] %vm1060_vm10, %v1172_v34 }
 0x20e   : > { %v1159_v29 = vpop.f32.mrf.mxu0 }
 0x20f   : > { %v1160_v8 = vadd.f32 %v2383_v40, %v1159_v29 }
 0x211   : > { %1205 = vst.msk [vmem:[%s2394_s13 + $0x8] sm:$0xff] %vm1060_vm10, %v1160_v8 }
 0x21d   : > { %v1186_v11 = vpop.f32.mrf.mxu2 }
 0x21e   : > { %v1187_v35 = vadd.f32 %v2383_v40, %v1186_v11 }
 0x220   : > { %1214 = vst.msk [vmem:[%s2394_s13 + $0x50] sm:$0xff] %vm1060_vm10, %v1187_v35 }
 0x224   : > { %v1198_v53 = vpop.f32.mrf.mxu3 }
 0x225   : > { %v1199_v7 = vadd.f32 %v2383_v40, %v1198_v53 }
 0x227   : > { %1218 = vst.msk [vmem:[%s2394_s13 + $0x70] sm:$0xff] %vm1060_vm10, %v1199_v7 }
 0x23e   : > { %v1162_v60 = vpop.f32.mrf.mxu0  ;;  %v1174_v43 = vpop.f32.mrf.mxu1 }
 0x23f   : > { %v1163_v0 = vadd.f32 %v2383_v40, %v1162_v60  ;;  %v1175_v55 = vadd.f32 %v2383_v40, %v1174_v43 }
 0x241   : > { %1206 = vst.msk [vmem:[%s2394_s13 + $0x10] sm:$0xff] %vm1060_vm10, %v1163_v0 }
 0x242   : > { %1210 = vst.msk [vmem:[%s2394_s13 + $0x30] sm:$0xff] %vm1060_vm10, %v1175_v55 }
 0x24c   : > { %v1189_v31 = vpop.f32.mrf.mxu2 }
 0x24d   : > { %v1190_v15 = vadd.f32 %v2383_v40, %v1189_v31  ;;  %v1201_v42 = vpop.f32.mrf.mxu3 }
 0x24e   : > { %v1202_v1 = vadd.f32 %v2383_v40, %v1201_v42 }
 0x24f   : > { %1215 = vst.msk [vmem:[%s2394_s13 + $0x58] sm:$0xff] %vm1060_vm10, %v1190_v15 }
 0x250   : > { %1219 = vst.msk [vmem:[%s2394_s13 + $0x78] sm:$0xff] %vm1060_vm10, %v1202_v1 }
 0x25e   : > { %v1177_v47 = vpop.f32.mrf.mxu1 }
 0x25f   : > { %v1165_v18 = vpop.f32.mrf.mxu0  ;;  %v1178_v56 = vadd.f32 %v2383_v40, %v1177_v47 }
 0x260   : > { %v1166_v37 = vadd.f32 %v2383_v40, %v1165_v18 }
 0x261   : > { %1211 = vst.msk [vmem:[%s2394_s13 + $0x38] sm:$0xff] %vm1060_vm10, %v1178_v56 }
 0x262   : > { %1207 = vst.msk [vmem:[%s2394_s13 + $0x18] sm:$0xff] %vm1060_vm10, %v1166_v37 }
 0x263 PF: > { %s15_s22 = sadd.s32 1, %s1510_s22   ;;  %s2493_s18 = smov %s1502_s20 }
 0x264   : > { %p12_p10 = scmp.ge.s32.totalorder %s15_s22, 6   ;;  %s2494_s19 = smov %s1506_s21 }
 0x265   : > { %s2495_s20 = smov %s2498_s23  ;;  %s2496_s21 = smov %s2502_s24 }
 0x266   :  { %14 = sbr.rel (!%p12_p10) target bundleno = 3 (0x3), region = 76 }

</bundles_post_ra>
